<compile_context>
chip_gen: v6e
topology: v6e:2x2x1
jax: 0.10.0
libtpu: 0.0.40
codegen_flags: <defaults>
</compile_context>

<pallas_src>
import numpy as np
import jax
import jax.numpy as jnp
from jax import lax
from jax.experimental import pallas as pl
from jax.experimental.pallas import tpu as pltpu


# ----------------------------------------------------------------------------
# Host-side, shape-only constants
# ----------------------------------------------------------------------------
def _bilinear_matrix(in_size: int, out_size: int) -> np.ndarray:
    """Interpolation matrix U (out, in) for bilinear upsampling, align_corners=True
    (the semantics of nn.UpsamplingBilinear2d)."""
    U = np.zeros((out_size, in_size), dtype=np.float32)
    if out_size == 1:
        U[0, 0] = 1.0
        return U
    scale = (in_size - 1) / (out_size - 1)
    for i in range(out_size):
        src = i * scale
        i0 = min(int(np.floor(src)), in_size - 1)
        i1 = min(i0 + 1, in_size - 1)
        w1 = src - i0
        U[i, i0] += 1.0 - w1
        U[i, i1] += w1
    return U


def _row_upsample_padded(H: int, H2: int) -> np.ndarray:
    """Uh_pad (H2+2, H): bilinear row upsample with zero first/last rows, which
    implement the 3x3 conv's zero padding along H."""
    Uh = _bilinear_matrix(H, H2)
    Uh_pad = np.zeros((H2 + 2, H), dtype=np.float32)
    Uh_pad[1:H2 + 1] = Uh
    return Uh_pad


def _col_tap_tensor(W: int, W2: int) -> np.ndarray:
    """T[dw, w, b] = Uw_pad[b + dw, w]: column upsample (with conv W zero padding)
    combined with the dw column shift of the 3x3 conv."""
    Uw = _bilinear_matrix(W, W2)
    Uw_pad = np.zeros((W2 + 2, W), dtype=np.float32)
    Uw_pad[1:W2 + 1] = Uw
    T = np.zeros((3, W, W2), dtype=np.float32)
    for dw in range(3):
        T[dw] = Uw_pad[dw:dw + W2].T
    return T


# ----------------------------------------------------------------------------
# Pallas kernels
# ----------------------------------------------------------------------------
def _upconv_kernel(x_ref, uh_ref, c_ref, y_ref, stats_ref):
    # x_ref:     (1, H, W*Cin)        bf16  original-resolution input (one image)
    # uh_ref:    (H2+2, H)            bf16  padded row-upsample matrix
    # c_ref:     (3, W*Cin, W2*Cout)  bf16  folded (col-upsample x conv-tap) matrices
    # y_ref:     (1, H2, W2*Cout)     bf16  conv rows, lane-dense (bias dropped: BN absorbs it)
    # stats_ref: (1, 2, W2*Cout)      f32   row 0 = per-image sum, row 1 = sum of squares
    H2 = y_ref.shape[1]
    x2d = x_ref[0]                                              # (H, W*Cin)

    # Row upsample once for the whole image (conv's H padding is baked into Uh_pad).
    th_pad = jnp.dot(uh_ref[...], x2d,
                     preferred_element_type=jnp.float32)        # (H2+2, W*Cin) f32

    acc = jnp.zeros((H2, y_ref.shape[2]), jnp.float32)
    for dh in range(3):                                         # static unroll, 3 row taps
        lhs = th_pad[dh:dh + H2].astype(jnp.bfloat16)           # shifted row window
        acc += jnp.dot(lhs, c_ref[dh],
                       preferred_element_type=jnp.float32)      # (H2, W2*Cout)

    y_ref[0] = acc.astype(y_ref.dtype)

    # Compact BN partial stats (per (w2, cout) lane) from the f32 accumulator; the
    # tiny cross-lane / cross-image reduction is finished in the wrapper.
    s = jnp.sum(acc, axis=0, keepdims=True)                     # (1, W2*Cout)
    q = jnp.sum(acc * acc, axis=0, keepdims=True)               # (1, W2*Cout)
    stats_ref[0] = jnp.concatenate([s, q], axis=0)              # (2, W2*Cout)


def _bn_relu_kernel(y_ref, scale_ref, shift_ref, o_ref):
    # y: (1, H2, W2*Cout) bf16; scale/shift: (1, W2*Cout) f32 (per-channel, tiled over w2)
    o_ref[0] = jnp.maximum(
        y_ref[0].astype(jnp.float32) * scale_ref[...] + shift_ref[...], 0.0)


# ----------------------------------------------------------------------------
# pallas_call wrappers
# ----------------------------------------------------------------------------
def _upconv_call(x2d, uh_pad, c_mats):
    N, H, WCin = x2d.shape
    H2 = uh_pad.shape[0] - 2
    WCout = c_mats.shape[-1]
    return pl.pallas_call(
        _upconv_kernel,
        out_shape=(
            jax.ShapeDtypeStruct((N, H2, WCout), jnp.bfloat16),   # conv slab (intermediate)
            jax.ShapeDtypeStruct((N, 2, WCout), jnp.float32),     # [sum, sumsq] per image
        ),
        grid=(N,),
        in_specs=[
            pl.BlockSpec((1, H, WCin), lambda n: (n, 0, 0)),
            pl.BlockSpec((H2 + 2, H), lambda n: (0, 0)),
            pl.BlockSpec((3, WCin, WCout), lambda n: (0, 0, 0)),
        ],
        out_specs=(
            pl.BlockSpec((1, H2, WCout), lambda n: (n, 0, 0)),
            pl.BlockSpec((1, 2, WCout), lambda n: (n, 0, 0)),
        ),
        compiler_params=pltpu.CompilerParams(
            dimension_semantics=("parallel",),
            # c_mats is resident + double-buffered; budget explicitly so larger
            # channel counts fail loudly instead of silently shrinking tiles.
            vmem_limit_bytes=32 * 1024 * 1024),
    )(x2d, uh_pad, c_mats)


def _bn_relu_call(y, scale_row, shift_row):
    N, H2, WCout = y.shape
    return pl.pallas_call(
        _bn_relu_kernel,
        out_shape=jax.ShapeDtypeStruct((N, H2, WCout), jnp.float32),
        grid=(N,),
        in_specs=[
            pl.BlockSpec((1, H2, WCout), lambda n: (n, 0, 0)),
            pl.BlockSpec((1, WCout), lambda n: (0, 0)),
            pl.BlockSpec((1, WCout), lambda n: (0, 0)),
        ],
        out_specs=pl.BlockSpec((1, H2, WCout), lambda n: (n, 0, 0)),
        compiler_params=pltpu.CompilerParams(
            dimension_semantics=("parallel",)),
    )(y, scale_row, shift_row)


# ----------------------------------------------------------------------------
# Full forward pass (Up_Conv)
# ----------------------------------------------------------------------------
def up_conv_forward(x_nchw, params):
    w, gamma, beta = params["w"], params["gamma"], params["beta"]
    # params["b"] (conv bias) is intentionally unused: conv bias followed by
    # training-mode BatchNorm cancels exactly (the batch mean absorbs it).
    N, Cin, H, W = x_nchw.shape
    Cout = w.shape[0]
    H2, W2 = 2 * H, 2 * W
    WCout = W2 * Cout
    eps = 1e-5

    # ---- host-side constants (depend only on shapes) ----
    uh_pad = jnp.asarray(_row_upsample_padded(H, H2), dtype=jnp.bfloat16)
    T = jnp.asarray(_col_tap_tensor(W, W2))                     # (3, W, W2)

    # ---- fold (column upsample x 3x3 column taps x weights) into C[dh] ----
    # C[dh][w*Cin+c, b*Cout+o] = sum_dw Uw_pad[b+dw, w] * weight[o, c, dh, dw]
    # TODO(synk): cache per weight set for inference-style use instead of re-folding
    # on every call; it is tiny here but is fixed per-call XLA work.
    w_f32 = w.astype(jnp.float32)
    c_mats = jnp.einsum("ewb,oche->hwcbo", T, w_f32)            # (3, W, Cin, W2, Cout)
    c_mats = c_mats.reshape(3, W * Cin, WCout).astype(jnp.bfloat16)

    # ---- NCHW -> channels-last flattened (N, H, W*Cin), bf16 MXU operands ----
    x2d = jnp.transpose(x_nchw, (0, 2, 3, 1)).reshape(N, H, W * Cin)
    x2d = x2d.astype(jnp.bfloat16)

    # ---- fused upsample + 3x3 conv + compact BN partial stats (one Pallas kernel) ----
    conv, stats = _upconv_call(x2d, uh_pad, c_mats)

    # ---- finish BatchNorm2d statistics (training mode, biased variance) in f32 ----
    count = N * H2 * W2
    ssum = stats[:, 0, :].sum(axis=0).reshape(W2, Cout).sum(axis=0)
    sqsum = stats[:, 1, :].sum(axis=0).reshape(W2, Cout).sum(axis=0)
    mean = ssum / count
    # TODO(synk): E[x^2]-mean^2 can cancel for large-magnitude activations; use a
    # two-pass (centered) reduction if this op is used well beyond these sizes.
    var = jnp.maximum(sqsum / count - mean * mean, 0.0)
    scale = gamma * lax.rsqrt(var + eps)
    shift = beta - mean * scale
    scale_row = jnp.tile(scale, W2).reshape(1, WCout)
    shift_row = jnp.tile(shift, W2).reshape(1, WCout)

    # ---- BN + ReLU: lane-dense elementwise pass over the bf16 conv slab ----
    y = _bn_relu_call(conv, scale_row, shift_row)               # (N, H2, W2*Cout) f32

    y = y.reshape(N, H2, W2, Cout)
    return jnp.transpose(y, (0, 3, 1, 2))                       # back to NCHW


# ----------------------------------------------------------------------------
# Pure-JAX reference (for a sanity check)
# ----------------------------------------------------------------------------
def up_conv_reference(x_nchw, params):
    w, b, gamma, beta = params["w"], params["b"], params["gamma"], params["beta"]
    N, Cin, H, W = x_nchw.shape
    H2, W2 = 2 * H, 2 * W
    Uh = jnp.asarray(_bilinear_matrix(H, H2))
    Uw = jnp.asarray(_bilinear_matrix(W, W2))
    up = jnp.einsum("ah,nchw->ncaw", Uh, x_nchw)
    up = jnp.einsum("bw,ncaw->ncab", Uw, up)                    # (N, C, H2, W2)
    conv = lax.conv_general_dilated(
        up, w, window_strides=(1, 1), padding=((1, 1), (1, 1)),
        dimension_numbers=("NCHW", "OIHW", "NCHW")) + b[None, :, None, None]
    mean = jnp.mean(conv, axis=(0, 2, 3), keepdims=True)
    var = jnp.var(conv, axis=(0, 2, 3), keepdims=True)          # biased, as BN fwd
    y = gamma[None, :, None, None] * (conv - mean) * lax.rsqrt(var + 1e-5) \
        + beta[None, :, None, None]
    return jnp.maximum(y, 0.0)


# ----------------------------------------------------------------------------
if __name__ == "__main__":
    N, in_ch, out_ch, H, W = 2, 4, 8, 16, 16

    key = jax.random.PRNGKey(0)
    k_x, k_w, k_b, k_g, k_bt = jax.random.split(key, 5)
    x = jax.random.normal(k_x, (N, in_ch, H, W), dtype=jnp.float32)
    params = {
        "w": 0.1 * jax.random.normal(k_w, (out_ch, in_ch, 3, 3), dtype=jnp.float32),
        "b": 0.05 * jax.random.normal(k_b, (out_ch,), dtype=jnp.float32),
        "gamma": 1.0 + 0.1 * jax.random.normal(k_g, (out_ch,), dtype=jnp.float32),
        "beta": 0.1 * jax.random.normal(k_bt, (out_ch,), dtype=jnp.float32),
    }

    fwd = jax.jit(up_conv_forward)
    out = jax.block_until_ready(fwd(x, params))
    ref = jax.block_until_ready(up_conv_reference(x, params))

    assert out.shape == (N, out_ch, 2 * H, 2 * W), out.shape
    # bf16 matmul operands + bf16 intermediate slab (f32 accumulation/statistics)
    # against an all-f32 reference on a BN-normalized (unit-scale) output.
    max_err = float(jnp.max(jnp.abs(out - ref)))
    assert max_err < 5e-2, f"max abs error too large: {max_err}"

    print("KERNEL_OK")
</pallas_src>

<mosaic_0001>
module attributes {stable_mosaic.version = 11 : i64} {
  func.func @_upconv_kernel(%arg0: i32, %arg1: memref<1x16x64xbf16, #tpu.memory_space<vmem>>, %arg2: memref<34x16xbf16, #tpu.memory_space<vmem>>, %arg3: memref<3x64x256xbf16, #tpu.memory_space<vmem>>, %arg4: memref<1x32x256xbf16, #tpu.memory_space<vmem>>, %arg5: memref<1x2x256xf32, #tpu.memory_space<vmem>>) attributes {dimension_semantics = [#tpu.dimension_semantics<parallel>], iteration_bounds = array<i64: 2>, scalar_prefetch = 0 : i64, scratch_operands = 0 : i64, tpu.core_type = #tpu.core_type<tc>, window_params = [{transform_indices = @transform_0, window_bounds = array<i64: 1, 16, 64>}, {pipeline_mode = #tpu.pipeline_mode<synchronous>, transform_indices = @transform_1, window_bounds = array<i64: 34, 16>}, {pipeline_mode = #tpu.pipeline_mode<synchronous>, transform_indices = @transform_2, window_bounds = array<i64: 3, 64, 256>}, {transform_indices = @transform_3, window_bounds = array<i64: 1, 32, 256>}, {transform_indices = @transform_4, window_bounds = array<i64: 1, 2, 256>}]} {
    %c0 = arith.constant 0 : index
    %c0_0 = arith.constant 0 : index
    %c0_1 = arith.constant 0 : index
    %0 = vector.load %arg1[%c0, %c0_0, %c0_1] : memref<1x16x64xbf16, #tpu.memory_space<vmem>>, vector<1x16x64xbf16>
    %1 = vector.shape_cast %0 : vector<1x16x64xbf16> to vector<16x64xbf16>
    %c0_2 = arith.constant 0 : index
    %c0_3 = arith.constant 0 : index
    %2 = vector.load %arg2[%c0_2, %c0_3] : memref<34x16xbf16, #tpu.memory_space<vmem>>, vector<34x16xbf16>
    %cst = arith.constant dense<0.000000e+00> : vector<34x64xf32>
    %3 = tpu.matmul %2, %1, %cst {dimension_numbers = #tpu.dot_dimension_numbers<[1], [0], [0], [1], [0, 0, 1, 1], [], []>} : vector<34x16xbf16>, vector<16x64xbf16>, vector<34x64xf32> -> vector<34x64xf32>
    %cst_4 = arith.constant 0.000000e+00 : f32
    %4 = vector.broadcast %cst_4 : f32 to vector<32x256xf32>
    %5 = vector.extract_strided_slice %3 {offsets = [0, 0], sizes = [32, 64], strides = [1, 1]} : vector<34x64xf32> to vector<32x64xf32>
    %6 = arith.truncf %5 : vector<32x64xf32> to vector<32x64xbf16>
    %c0_5 = arith.constant 0 : index
    %c0_6 = arith.constant 0 : index
    %c0_7 = arith.constant 0 : index
    %7 = vector.load %arg3[%c0_5, %c0_6, %c0_7] : memref<3x64x256xbf16, #tpu.memory_space<vmem>>, vector<1x64x256xbf16>
    %8 = vector.shape_cast %7 : vector<1x64x256xbf16> to vector<64x256xbf16>
    %cst_8 = arith.constant dense<0.000000e+00> : vector<32x256xf32>
    %9 = tpu.matmul %6, %8, %cst_8 {dimension_numbers = #tpu.dot_dimension_numbers<[1], [0], [0], [1], [0, 0, 1, 1], [], []>} : vector<32x64xbf16>, vector<64x256xbf16>, vector<32x256xf32> -> vector<32x256xf32>
    %10 = arith.addf %4, %9 : vector<32x256xf32>
    %11 = vector.extract_strided_slice %3 {offsets = [1, 0], sizes = [32, 64], strides = [1, 1]} : vector<34x64xf32> to vector<32x64xf32>
    %12 = arith.truncf %11 : vector<32x64xf32> to vector<32x64xbf16>
    %c1 = arith.constant 1 : index
    %c0_9 = arith.constant 0 : index
    %c0_10 = arith.constant 0 : index
    %13 = vector.load %arg3[%c1, %c0_9, %c0_10] : memref<3x64x256xbf16, #tpu.memory_space<vmem>>, vector<1x64x256xbf16>
    %14 = vector.shape_cast %13 : vector<1x64x256xbf16> to vector<64x256xbf16>
    %cst_11 = arith.constant dense<0.000000e+00> : vector<32x256xf32>
    %15 = tpu.matmul %12, %14, %cst_11 {dimension_numbers = #tpu.dot_dimension_numbers<[1], [0], [0], [1], [0, 0, 1, 1], [], []>} : vector<32x64xbf16>, vector<64x256xbf16>, vector<32x256xf32> -> vector<32x256xf32>
    %16 = arith.addf %10, %15 : vector<32x256xf32>
    %17 = vector.extract_strided_slice %3 {offsets = [2, 0], sizes = [32, 64], strides = [1, 1]} : vector<34x64xf32> to vector<32x64xf32>
    %18 = arith.truncf %17 : vector<32x64xf32> to vector<32x64xbf16>
    %c2 = arith.constant 2 : index
    %c0_12 = arith.constant 0 : index
    %c0_13 = arith.constant 0 : index
    %19 = vector.load %arg3[%c2, %c0_12, %c0_13] : memref<3x64x256xbf16, #tpu.memory_space<vmem>>, vector<1x64x256xbf16>
    %20 = vector.shape_cast %19 : vector<1x64x256xbf16> to vector<64x256xbf16>
    %cst_14 = arith.constant dense<0.000000e+00> : vector<32x256xf32>
    %21 = tpu.matmul %18, %20, %cst_14 {dimension_numbers = #tpu.dot_dimension_numbers<[1], [0], [0], [1], [0, 0, 1, 1], [], []>} : vector<32x64xbf16>, vector<64x256xbf16>, vector<32x256xf32> -> vector<32x256xf32>
    %22 = arith.addf %16, %21 : vector<32x256xf32>
    %23 = arith.truncf %22 : vector<32x256xf32> to vector<32x256xbf16>
    %c0_15 = arith.constant 0 : index
    %c0_16 = arith.constant 0 : index
    %c0_17 = arith.constant 0 : index
    %24 = vector.load %arg4[%c0_15, %c0_16, %c0_17] : memref<1x32x256xbf16, #tpu.memory_space<vmem>>, vector<1x32x256xbf16>
    %25 = vector.shape_cast %24 : vector<1x32x256xbf16> to vector<32x256xbf16>
    %26 = vector.shape_cast %23 : vector<32x256xbf16> to vector<1x32x256xbf16>
    tpu.vector_store %arg4[%c0_15, %c0_16, %c0_17], %26 {strides = array<i32>} : memref<1x32x256xbf16, #tpu.memory_space<vmem>>, vector<1x32x256xbf16>,
    %cst_18 = arith.constant dense<0.000000e+00> : vector<256xf32>
    %27 = vector.multi_reduction <add>, %22, %cst_18 [0] : vector<32x256xf32> to vector<256xf32>
    %28 = vector.shape_cast %27 : vector<256xf32> to vector<1x256xf32>
    %29 = arith.mulf %22, %22 : vector<32x256xf32>
    %cst_19 = arith.constant dense<0.000000e+00> : vector<256xf32>
    %30 = vector.multi_reduction <add>, %29, %cst_19 [0] : vector<32x256xf32> to vector<256xf32>
    %31 = vector.shape_cast %30 : vector<256xf32> to vector<1x256xf32>
    %32 = tpu.concatenate %28, %31 in 0 : vector<1x256xf32>, vector<1x256xf32> -> vector<2x256xf32>
    %c0_20 = arith.constant 0 : index
    %c0_21 = arith.constant 0 : index
    %c0_22 = arith.constant 0 : index
    %33 = vector.load %arg5[%c0_20, %c0_21, %c0_22] : memref<1x2x256xf32, #tpu.memory_space<vmem>>, vector<1x2x256xf32>
    %34 = vector.shape_cast %33 : vector<1x2x256xf32> to vector<2x256xf32>
    %35 = vector.shape_cast %32 : vector<2x256xf32> to vector<1x2x256xf32>
    tpu.vector_store %arg5[%c0_20, %c0_21, %c0_22], %35 {strides = array<i32>} : memref<1x2x256xf32, #tpu.memory_space<vmem>>, vector<1x2x256xf32>,
    return
  }
  func.func @transform_0(%arg0: i32) -> (i32, i32, i32) {
    %c0_i32 = arith.constant 0 : i32
    %c0_i32_0 = arith.constant 0 : i32
    %c0_i32_1 = arith.constant 0 : i32
    return %arg0, %c0_i32, %c0_i32_0 : i32, i32, i32
  }
  func.func @transform_1(%arg0: i32) -> (i32, i32) {
    %c0_i32 = arith.constant 0 : i32
    %c0_i32_0 = arith.constant 0 : i32
    %c0_i32_1 = arith.constant 0 : i32
    return %c0_i32, %c0_i32_0 : i32, i32
  }
  func.func @transform_2(%arg0: i32) -> (i32, i32, i32) {
    %c0_i32 = arith.constant 0 : i32
    %c0_i32_0 = arith.constant 0 : i32
    %c0_i32_1 = arith.constant 0 : i32
    %c0_i32_2 = arith.constant 0 : i32
    return %c0_i32, %c0_i32_0, %c0_i32_1 : i32, i32, i32
  }
  func.func @transform_3(%arg0: i32) -> (i32, i32, i32) {
    %c0_i32 = arith.constant 0 : i32
    %c0_i32_0 = arith.constant 0 : i32
    %c0_i32_1 = arith.constant 0 : i32
    return %arg0, %c0_i32, %c0_i32_0 : i32, i32, i32
  }
  func.func @transform_4(%arg0: i32) -> (i32, i32, i32) {
    %c0_i32 = arith.constant 0 : i32
    %c0_i32_0 = arith.constant 0 : i32
    %c0_i32_1 = arith.constant 0 : i32
    return %arg0, %c0_i32, %c0_i32_0 : i32, i32, i32
  }
}

module attributes {stable_mosaic.version = 11 : i64} {
  func.func @_bn_relu_kernel(%arg0: i32, %arg1: memref<1x32x256xbf16, #tpu.memory_space<vmem>>, %arg2: memref<1x256xf32, #tpu.memory_space<vmem>>, %arg3: memref<1x256xf32, #tpu.memory_space<vmem>>, %arg4: memref<1x32x256xf32, #tpu.memory_space<vmem>>) attributes {dimension_semantics = [#tpu.dimension_semantics<parallel>], iteration_bounds = array<i64: 2>, scalar_prefetch = 0 : i64, scratch_operands = 0 : i64, tpu.core_type = #tpu.core_type<tc>, window_params = [{transform_indices = @transform_0, window_bounds = array<i64: 1, 32, 256>}, {pipeline_mode = #tpu.pipeline_mode<synchronous>, transform_indices = @transform_1, window_bounds = array<i64: 1, 256>}, {pipeline_mode = #tpu.pipeline_mode<synchronous>, transform_indices = @transform_2, window_bounds = array<i64: 1, 256>}, {transform_indices = @transform_3, window_bounds = array<i64: 1, 32, 256>}]} {
    %c0 = arith.constant 0 : index
    %c0_0 = arith.constant 0 : index
    %c0_1 = arith.constant 0 : index
    %0 = vector.load %arg1[%c0, %c0_0, %c0_1] : memref<1x32x256xbf16, #tpu.memory_space<vmem>>, vector<1x32x256xbf16>
    %1 = vector.shape_cast %0 : vector<1x32x256xbf16> to vector<32x256xbf16>
    %2 = arith.extf %1 : vector<32x256xbf16> to vector<32x256xf32>
    %c0_2 = arith.constant 0 : index
    %c0_3 = arith.constant 0 : index
    %3 = vector.load %arg2[%c0_2, %c0_3] : memref<1x256xf32, #tpu.memory_space<vmem>>, vector<1x256xf32>
    %4 = vector.broadcast %3 : vector<1x256xf32> to vector<32x256xf32>
    %5 = arith.mulf %2, %4 : vector<32x256xf32>
    %c0_4 = arith.constant 0 : index
    %c0_5 = arith.constant 0 : index
    %6 = vector.load %arg3[%c0_4, %c0_5] : memref<1x256xf32, #tpu.memory_space<vmem>>, vector<1x256xf32>
    %7 = vector.broadcast %6 : vector<1x256xf32> to vector<32x256xf32>
    %8 = arith.addf %5, %7 : vector<32x256xf32>
    %cst = arith.constant 0.000000e+00 : f32
    %9 = vector.broadcast %cst : f32 to vector<32x256xf32>
    %10 = arith.maximumf %8, %9 : vector<32x256xf32>
    %c0_6 = arith.constant 0 : index
    %c0_7 = arith.constant 0 : index
    %c0_8 = arith.constant 0 : index
    %11 = vector.load %arg4[%c0_6, %c0_7, %c0_8] : memref<1x32x256xf32, #tpu.memory_space<vmem>>, vector<1x32x256xf32>
    %12 = vector.shape_cast %11 : vector<1x32x256xf32> to vector<32x256xf32>
    %13 = vector.shape_cast %10 : vector<32x256xf32> to vector<1x32x256xf32>
    tpu.vector_store %arg4[%c0_6, %c0_7, %c0_8], %13 {strides = array<i32>} : memref<1x32x256xf32, #tpu.memory_space<vmem>>, vector<1x32x256xf32>,
    return
  }
  func.func @transform_0(%arg0: i32) -> (i32, i32, i32) {
    %c0_i32 = arith.constant 0 : i32
    %c0_i32_0 = arith.constant 0 : i32
    %c0_i32_1 = arith.constant 0 : i32
    return %arg0, %c0_i32, %c0_i32_0 : i32, i32, i32
  }
  func.func @transform_1(%arg0: i32) -> (i32, i32) {
    %c0_i32 = arith.constant 0 : i32
    %c0_i32_0 = arith.constant 0 : i32
    %c0_i32_1 = arith.constant 0 : i32
    return %c0_i32, %c0_i32_0 : i32, i32
  }
  func.func @transform_2(%arg0: i32) -> (i32, i32) {
    %c0_i32 = arith.constant 0 : i32
    %c0_i32_0 = arith.constant 0 : i32
    %c0_i32_1 = arith.constant 0 : i32
    return %c0_i32, %c0_i32_0 : i32, i32
  }
  func.func @transform_3(%arg0: i32) -> (i32, i32, i32) {
    %c0_i32 = arith.constant 0 : i32
    %c0_i32_0 = arith.constant 0 : i32
    %c0_i32_1 = arith.constant 0 : i32
    return %arg0, %c0_i32, %c0_i32_0 : i32, i32, i32
  }
}

</mosaic_0001>

<bundles_post_ra>
// kernel: tile.13
= control target key start
LH: loop header
LB: loop body
LE: loop exit
PB: predicated region body
PF: predicated region fallthrough
CT: control target
= control target key end

     0   :  { %s40_s0 = inlined_call_operand.vmem [shape: f32[8], index: 0, kind: input, shape index: {}]   ;;  %s41_s1 = inlined_call_operand.vmem [shape: f32[32,8], index: 1, kind: output, shape index: {}]  }
   0x1   :  { %v4_v0 = vld [vmem:[%s40_s0] ss:$0 sm:$0xff] }
   0x2   :  { %5 = vst [vmem:[%s41_s1] sm:$0xff] %v4_v0  ;;  %12 = vst [vmem:[%s41_s1 + $0x8] sm:$0xff] %v4_v0 }
   0x3   :  { %13 = vst [vmem:[%s41_s1 + $0x10] sm:$0xff] %v4_v0  ;;  %14 = vst [vmem:[%s41_s1 + $0x18] sm:$0xff] %v4_v0 }

// kernel: tile.14
= control target key start
LH: loop header
LB: loop body
LE: loop exit
PB: predicated region body
PF: predicated region fallthrough
CT: control target
= control target key end

     0   :  { %s7_s6 = smov 3  ;;  %s21_s9 = smov 3  ;;  %vm4_vm0 = vcmask 64512   ;;  %vm11_vm1 = vcmask 1048512   ;;  %vm18_vm2 = vcmask 982912   ;;  %vm25_vm3 = vcmask 917312   ;;  %s235_s0 = inlined_call_operand.vmem [shape: f32[32,8], index: 0, kind: input, shape index: {}]   ;;  %s236_s1 = inlined_call_operand.vmem [shape: f32[1,256], index: 1, kind: output, shape index: {}]  }
   0x1   :  { %v125_v0 = vld [vmem:[%s235_s0 + $0xf] ss:$16 sm:%s7_s6]   ;;  %s156_s10 = smov 120   ;;  %v127_v1 = vld [vmem:[%s235_s0 + $0xd] ss:$16 sm:%s21_s9]   ;;  %s14_s13 = smov 3 }
   0x2   :  { %9 = vrot.lane.b32.xlu0 %v125_v0, %s156_s10  ;;  %s157_s14 = smov 104   ;;  %v126_v2 = vld [vmem:[%s235_s0 + $0xe] ss:$16 sm:%s14_s13]   ;;  %s28_s17 = smov 3  ;;  %vm32_vm4 = vcmask 851712   ;;  %vm39_vm5 = vcmask 786112  }
   0x3   :  { %23 = vrot.lane.b32.xlu1 %v127_v1, %s157_s14  ;;  %v128_v3 = vld [vmem:[%s235_s0 + $0xc] ss:$16 sm:%s28_s17]   ;;  %s35_s20 = smov 3  ;;  %s42_s21 = smov 3  ;;  %vm46_vm6 = vcmask 720512   ;;  %vm53_vm7 = vcmask 654912  }
   0x4   :  { %s158_s22 = smov 112   ;;  %s159_s23 = smov 96   ;;  %v129_v4 = vld [vmem:[%s235_s0 + $0xb] ss:$16 sm:%s35_s20]   ;;  %v130_v5 = vld [vmem:[%s235_s0 + $0xa] ss:$16 sm:%s42_s21]  }
   0x5   :  { %s49_s28 = smov 3  ;;  %s56_s29 = smov 3  ;;  %vm60_vm8 = vcmask 589312   ;;  %vm67_vm9 = vcmask 523712   ;;  %vm74_vm10 = vcmask 458112   ;;  %vm81_vm11 = vcmask 392512  }
   0x6   :  { %16 = vrot.lane.b32.xlu0 %v126_v2, %s158_s22  ;;  %s160_s30 = smov 88   ;;  %s161_s2 = smov 80   ;;  %v131_v6 = vld [vmem:[%s235_s0 + $0x9] ss:$16 sm:%s49_s28]   ;;  %vm88_vm12 = vcmask 326912   ;;  %vm95_vm13 = vcmask 261312  }
   0x7   :  { %30 = vrot.lane.b32.xlu1 %v128_v3, %s159_s23  ;;  %v132_v7 = vld [vmem:[%s235_s0 + $0x8] ss:$16 sm:%s56_s29]   ;;  %s63_s7 = smov 3  ;;  %s70_s8 = smov 3  ;;  %vm102_vm14 = vcmask 195712   ;;  %vm109_vm15 = vcmask 130112  }
   0x8   :  { %s162_s9 = smov 72   ;;  %s163_s10 = smov 64   ;;  %v133_v8 = vld [vmem:[%s235_s0 + $0x7] ss:$16 sm:%s63_s7]   ;;  %v134_v9 = vld [vmem:[%s235_s0 + $0x6] ss:$16 sm:%s70_s8]  }
   0x9   :  { %s2_s13 = smov 3  ;;  %s77_s16 = smov 3 }
   0xa   :  { %37 = vrot.lane.b32.xlu0 %v129_v4, %s160_s30  ;;  %v3_v10 = vld [vmem:[%s235_s0] ss:$16 sm:%s2_s13]   ;;  %s84_s19 = smov 3  ;;  %s164_s20 = smov 56  }
   0xb   :  { %44 = vrot.lane.b32.xlu1 %v130_v5, %s161_s2  ;;  %5 = vst.msk [vmem:[#allocation0] ss:$8 sm:$0x3] %vm4_vm0, %v3_v10   ;;  %s165_s21 = smov 48   ;;  %v135_v11 = vld [vmem:[%s235_s0 + $0x5] ss:$16 sm:%s77_s16]  }
   0xc   :  { %v136_v12 = vld [vmem:[%s235_s0 + $0x4] ss:$16 sm:%s84_s19]   ;;  %s91_s26 = smov 3  ;;  %s98_s27 = smov 3 }
   0xd   :  { %s166_s28 = smov 40   ;;  %s167_s29 = smov 32   ;;  %v137_v13 = vld [vmem:[%s235_s0 + $0x3] ss:$16 sm:%s91_s26]   ;;  %v138_v14 = vld [vmem:[%s235_s0 + $0x2] ss:$16 sm:%s98_s27]  }
   0xe   :  { %51 = vrot.lane.b32.xlu0 %v131_v6, %s162_s9  ;;  %s105_s5 = smov 3  ;;  %s168_s6 = smov 24  }
   0xf   :  { %58 = vrot.lane.b32.xlu1 %v132_v7, %s163_s10  ;;  %s169_s7 = smov 16   ;;  %v139_v15 = vld [vmem:[%s235_s0 + $0x1] ss:$16 sm:%s105_s5]   ;;  %s170_s0 = smov 8  }
  0x12   :  { %65 = vrot.lane.b32.xlu0 %v133_v8, %s164_s20 }
  0x13   :  { %72 = vrot.lane.b32.xlu1 %v134_v9, %s165_s21 }
  0x16   :  { %79 = vrot.lane.b32.xlu0 %v135_v11, %s166_s28 }
  0x17   :  { %86 = vrot.lane.b32.xlu1 %v136_v12, %s167_s29 }
  0x1a   :  { %93 = vrot.lane.b32.xlu0 %v137_v13, %s168_s6 }
  0x1b   :  { %100 = vrot.lane.b32.xlu1 %v138_v14, %s169_s7 }
  0x1e   :  { %107 = vrot.lane.b32.xlu0 %v139_v15, %s170_s0 }
  0x74   :  { %v10_v16 = vpop.permute.xlu0 %9  }
  0x75   :  { %12 = vst.msk [vmem:[#allocation0] ss:$8 sm:$0x3] %vm11_vm1, %v10_v16   ;;  %v24_v17 = vpop.permute.xlu1 %23  }
  0x78   :  { %v17_v18 = vpop.permute.xlu0 %16  }
  0x79   :  { %19 = vst.msk [vmem:[#allocation0] ss:$8 sm:$0x3] %vm18_vm2, %v17_v18   ;;  %v31_v19 = vpop.permute.xlu1 %30  }
  0x7a   :  { %26 = vst.msk [vmem:[#allocation0] ss:$8 sm:$0x3] %vm25_vm3, %v24_v17  }
  0x7b   :  { %33 = vst.msk [vmem:[#allocation0] ss:$8 sm:$0x3] %vm32_vm4, %v31_v19  }
  0x7c   :  { %v38_v20 = vpop.permute.xlu0 %37  }
  0x7d   :  { %40 = vst.msk [vmem:[#allocation0] ss:$8 sm:$0x3] %vm39_vm5, %v38_v20   ;;  %v45_v21 = vpop.permute.xlu1 %44  }
  0x7e   :  { %47 = vst.msk [vmem:[#allocation0] ss:$8 sm:$0x3] %vm46_vm6, %v45_v21  }
  0x80   :  { %v52_v22 = vpop.permute.xlu0 %51  }
  0x81   :  { %54 = vst.msk [vmem:[#allocation0] ss:$8 sm:$0x3] %vm53_vm7, %v52_v22   ;;  %v59_v23 = vpop.permute.xlu1 %58  }
  0x82   :  { %61 = vst.msk [vmem:[#allocation0] ss:$8 sm:$0x3] %vm60_vm8, %v59_v23  }
  0x84   :  { %v66_v24 = vpop.permute.xlu0 %65  }
  0x85   :  { %68 = vst.msk [vmem:[#allocation0] ss:$8 sm:$0x3] %vm67_vm9, %v66_v24   ;;  %v73_v25 = vpop.permute.xlu1 %72  }
  0x86   :  { %75 = vst.msk [vmem:[#allocation0] ss:$8 sm:$0x3] %vm74_vm10, %v73_v25  }
  0x88   :  { %v80_v26 = vpop.permute.xlu0 %79  }
  0x89   :  { %82 = vst.msk [vmem:[#allocation0] ss:$8 sm:$0x3] %vm81_vm11, %v80_v26   ;;  %v87_v27 = vpop.permute.xlu1 %86  }
  0x8a   :  { %89 = vst.msk [vmem:[#allocation0] ss:$8 sm:$0x3] %vm88_vm12, %v87_v27  }
  0x8c   :  { %v94_v28 = vpop.permute.xlu0 %93  }
  0x8d   :  { %96 = vst.msk [vmem:[#allocation0] ss:$8 sm:$0x3] %vm95_vm13, %v94_v28   ;;  %v101_v29 = vpop.permute.xlu1 %100  }
  0x8e   :  { %103 = vst.msk [vmem:[#allocation0] ss:$8 sm:$0x3] %vm102_vm14, %v101_v29  }
  0x90   :  { %v108_v30 = vpop.permute.xlu0 %107  }
  0x91   :  { %110 = vst.msk [vmem:[#allocation0] ss:$8 sm:$0x3] %vm109_vm15, %v108_v30  }
  0x98   :  { %v115_v31 = vld [vmem:[#allocation0] sm:$0x1]  ;;  %v120_v32 = vld [vmem:[#allocation0 + $0x8] sm:$0x1] }
  0x99   :  { %118 = vst [vmem:[%s236_s1] sm:$0x1] %v115_v31  ;;  %140 = vst [vmem:[%s236_s1 + $0x1] sm:$0x1] %v120_v32 }

// kernel: up_conv_forward.3
= control target key start
LH: loop header
LB: loop body
LE: loop exit
PB: predicated region body
PF: predicated region fallthrough
CT: control target
= control target key end

     0   :  { %s343_s12 = smov 0   ;;  %s370_s0 = inlined_call_operand.vmem [shape: bf16[2,32,256], index: 0, kind: input, shape index: {}]   ;;  %s371_s1 = inlined_call_operand.vmem [shape: f32[1,256], index: 1, kind: input, shape index: {}]   ;;  %s372_s2 = inlined_call_operand.vmem [shape: f32[1,256], index: 2, kind: input, shape index: {}]   ;;  %s373_s3 = inlined_call_operand.vmem [shape: f32[2,32,256], index: 3, kind: output, shape index: {}]  }
   0x1 LB: > { %s294_s13 = sadd.s32 4294967295, %s321_s12   ;;  %p298_p0 = scmp.ge.s32.totalorder %s321_s12, 1  ;;  %s321_s12 = sphi %s343_s12, %s13_s12  }
   0x2   : > { %p137_p1 = scmp.lt.s32.totalorder %s321_s12, 3 }
   0x4   : > { %p138_p2 = pnand %p298_p0, %p137_p1 }
   0x5   : > { %p161_p3 = scmp.lt.s32.totalorder (!%p138_p2), %s294_s13, 1 }
   0x6   : > { %141 = sbr.rel (%p138_p2) target bundleno = 29 (0x1d), region = 32 }
   0xb   : > { %v185_v0 = vlaneseq  ;;  %s375_s13 = smov (!%p161_p3, %s294_s13), 1  ;;  %v183_v2 = vld [vmem:[%s371_s1] sm:$0x3] }
   0xc   : > { %v203_v3 = vld [vmem:[%s372_s2] sm:$0x3]  ;;  %s305_s18 = sshll.u32 %s375_s13, 5  ;;  %s306_s22 = sshll.u32 %s375_s13, 6 }
   0xd   : > { %v186_v1 = vshrl.u32 %v185_v0, 7  ;;  %s165_s21 = scalar_lea.vmem %s370_s0, %s305_s18  ;;  %s170_s25 = scalar_lea.vmem %s373_s3, %s306_s22 }
   0xe   : > { %v171_v6 = vld [vmem:[%s165_s21] sm:$0xff]  ;;  %v172_v11 = vld [vmem:[%s165_s21 + $0x8] sm:$0xff]  ;;  %v173_v12 = vld [vmem:[%s165_s21 + $0x10] sm:$0xff] }
   0xf   : > { %v187_v4 = vsub.s32 0, %v186_v1  ;;  %v191_v5 = vsub.s32 1, %v186_v1  ;;  %v175_v13 = vunpack.c.l.bf16 %v171_v6  ;;  %v176_v14 = vunpack.c.h.bf16 %v171_v6  ;;  %v174_v17 = vld [vmem:[%s165_s21 + $0x18] sm:$0xff] }
  0x10   : > { %v177_v15 = vunpack.c.l.bf16 %v172_v11  ;;  %v178_v16 = vunpack.c.h.bf16 %v172_v11  ;;  %v179_v18 = vunpack.c.l.bf16 %v173_v12  ;;  %v180_v19 = vunpack.c.h.bf16 %v173_v12 }
  0x11   : > { %v188_v7 = vrot.slane %v183_v2, %v187_v4  ;;  %v208_v8 = vrot.slane %v203_v3, %v187_v4  ;;  %v192_v9 = vrot.slane %v183_v2, %v191_v5  ;;  %v212_v10 = vrot.slane %v203_v3, %v191_v5 }
  0x12   : > { %v181_v20 = vunpack.c.l.bf16 %v174_v17  ;;  %v182_v21 = vunpack.c.h.bf16 %v174_v17 }
  0x13   : > { %v195_v22 = vmul.f32 %v188_v7, %v175_v13  ;;  %v196_v23 = vmul.f32 %v192_v9, %v176_v14  ;;  %v197_v24 = vmul.f32 %v188_v7, %v177_v15  ;;  %v198_v25 = vmul.f32 %v192_v9, %v178_v16 }
  0x14   : > { %v199_v26 = vmul.f32 %v188_v7, %v179_v18  ;;  %v200_v27 = vmul.f32 %v192_v9, %v180_v19  ;;  %v201_v28 = vmul.f32 %v188_v7, %v181_v20  ;;  %v202_v29 = vmul.f32 %v192_v9, %v182_v21 }
  0x15   : > { %v215_v30 = vadd.f32 %v208_v8, %v195_v22  ;;  %v216_v31 = vadd.f32 %v212_v10, %v196_v23  ;;  %v217_v32 = vadd.f32 %v208_v8, %v197_v24  ;;  %v218_v33 = vadd.f32 %v212_v10, %v198_v25 }
  0x16   : > { %v219_v34 = vadd.f32 %v208_v8, %v199_v26  ;;  %v220_v35 = vadd.f32 %v212_v10, %v200_v27  ;;  %v221_v36 = vadd.f32 %v208_v8, %v201_v28  ;;  %v222_v37 = vadd.f32 %v212_v10, %v202_v29 }
  0x17   : > { %v223_v38 = vmax.f32 %v215_v30, 0.0  ;;  %v224_v39 = vmax.f32 %v216_v31, 0.0  ;;  %v225_v40 = vmax.f32 %v217_v32, 0.0  ;;  %v226_v41 = vmax.f32 %v218_v33, 0.0 }
  0x18   : > { %v227_v42 = vmax.f32 %v219_v34, 0.0  ;;  %v228_v43 = vmax.f32 %v220_v35, 0.0  ;;  %v229_v44 = vmax.f32 %v221_v36, 0.0  ;;  %v230_v45 = vmax.f32 %v222_v37, 0.0 }
  0x19   : > { %231 = vst [vmem:[%s170_s25] sm:$0xff] %v223_v38  ;;  %232 = vst [vmem:[%s170_s25 + $0x8] sm:$0xff] %v224_v39 }
  0x1a   : > { %233 = vst [vmem:[%s170_s25 + $0x10] sm:$0xff] %v225_v40  ;;  %234 = vst [vmem:[%s170_s25 + $0x18] sm:$0xff] %v226_v41 }
  0x1b   : > { %235 = vst [vmem:[%s170_s25 + $0x20] sm:$0xff] %v227_v42  ;;  %236 = vst [vmem:[%s170_s25 + $0x28] sm:$0xff] %v228_v43 }
  0x1c   : > { %237 = vst [vmem:[%s170_s25 + $0x30] sm:$0xff] %v229_v44  ;;  %238 = vst [vmem:[%s170_s25 + $0x38] sm:$0xff] %v230_v45 }
  0x1d PF: > { %s13_s12 = sadd.s32 1, %s321_s12  }
  0x1e   : > { %p10_p4 = scmp.ge.s32.totalorder %s13_s12, 4  }
  0x20   :  { %12 = sbr.rel (!%p10_p4) target bundleno = 1 (0x1), region = 62 }

// kernel: up_conv_forward.2
= control target key start
LH: loop header
LB: loop body
LE: loop exit
PB: predicated region body
PF: predicated region fallthrough
CT: control target
= control target key end

     0   :  { %s1025_s15 = smov 0   ;;  %s1157_s0 = inlined_call_operand.vmem [shape: bf16[2,16,64], index: 0, kind: input, shape index: {}]   ;;  %s1158_s1 = inlined_call_operand.vmem [shape: bf16[34,16], index: 1, kind: input, shape index: {}]   ;;  %s1159_s2 = inlined_call_operand.vmem [shape: bf16[3,64,256], index: 2, kind: input, shape index: {}]   ;;  %s1160_s3 = inlined_call_operand.vmem [shape: bf16[2,32,256], index: 3, kind: output, shape index: {0}]   ;;  %s1161_s4 = inlined_call_operand.vmem [shape: f32[2,2,256], index: 4, kind: output, shape index: {1}]  }
   0x1 LB: > { %s842_s16 = sadd.s32 4294967295, %s995_s15   ;;  %p846_p0 = scmp.ge.s32.totalorder %s995_s15, 1  ;;  %s995_s15 = sphi %s1025_s15, %s15_s15  }
   0x2   : > { %p165_p1 = scmp.lt.s32.totalorder %s995_s15, 3 }
   0x4   : > { %p166_p2 = pnand %p846_p0, %p165_p1 }
   0x5   : > { %p196_p3 = scmp.lt.s32.totalorder (!%p166_p2), %s842_s16, 1 }
   0x6   : > { %169 = sbr.rel (%p166_p2) target bundleno = 476 (0x1dc), region = 32 }
   0xb   : > { %v997_v0 = vmov 0.0   ;;  %vm998_vm0 = vmmov 0   ;;  %s1163_s16 = smov (!%p196_p3, %s842_s16), 1  ;;  %v950_v1 = vld [vmem:[%s1158_s1] sm:$0xff]   ;;  %v955_v2 = vld [vmem:[%s1159_s2 + $0x34] ss:$8 sps:$4 sm:$0xff]  }
   0xc   : > { %924 = vmatprep.subr.bf16.mxu0 %v997_v0  ;;  %926 = vmatprep.mubr.msk.bf16.mxu0 %vm998_vm0, %v997_v0  ;;  %s913_s17 = sshll.u32 %s1163_s16, 3  ;;  %v953_v4 = vld [vmem:[%s1159_s2 + $0x30] ss:$8 sps:$4 sm:$0xff]   ;;  %v958_v5 = vld [vmem:[%s1159_s2 + $0x24] ss:$8 sps:$4 sm:$0xff]   ;;  %vm238_vm1 = vcmask 130048  }
   0xd   : > { %s200_s20 = scalar_lea.vmem %s1157_s0, %s913_s17  ;;  %v956_v6 = vld [vmem:[%s1159_s2 + $0x20] ss:$8 sps:$4 sm:$0xff]   ;;  %v961_v7 = vld [vmem:[%s1159_s2 + $0x14] ss:$8 sps:$4 sm:$0xff]   ;;  %v959_v9 = vld [vmem:[%s1159_s2 + $0x10] ss:$8 sps:$4 sm:$0xff]  }
   0xe   : > { %v949_v3 = vld [vmem:[%s200_s20] sm:$0xff]   ;;  %v951_v8 = vld [vmem:[%s1158_s1 + $0x8] sm:$0xff]   ;;  %v952_v10 = vld [vmem:[%s1158_s1 + $0x10] ss:$0 sps:$4 sm:$0x11]   ;;  %v999_v15 = vmov 0  }
   0xf   : > { %925 = vmatpush3.bf16.msra.mxu0 %v949_v3  ;;  %v966_v11 = vld [vmem:[%s1159_s2 + $0x4] ss:$8 sps:$4 sm:$0xff]   ;;  %v962_v12 = vld [vmem:[%s1159_s2 + $0x74] ss:$8 sps:$4 sm:$0xff]   ;;  %v964_v13 = vld [vmem:[%s1159_s2] ss:$8 sps:$4 sm:$0xff]   ;;  %424 = vmatprep.mubr.bf16.mxu1 %v999_v15 }
  0x10   : > { %497 = vmatprep.subr.bf16.mxu0 %v955_v2  ;;  %v967_v14 = vld [vmem:[%s1159_s2 + $0x70] ss:$8 sps:$4 sm:$0xff]   ;;  %400 = vmatprep.subr.bf16.mxu1 %v962_v12  ;;  %v968_v16 = vld [vmem:[%s1159_s2 + $0x64] ss:$8 sps:$4 sm:$0xff]   ;;  %v970_v17 = vld [vmem:[%s1159_s2 + $0x60] ss:$8 sps:$4 sm:$0xff]  }
  0x11   : > { %401 = vmatpush1.bf16.msra.mxu1 %v967_v14  ;;  %v971_v18 = vld [vmem:[%s1159_s2 + $0x54] ss:$8 sps:$4 sm:$0xff]   ;;  %v973_v19 = vld [vmem:[%s1159_s2 + $0x50] ss:$8 sps:$4 sm:$0xff]   ;;  %v974_v20 = vld [vmem:[%s1159_s2 + $0x44] ss:$8 sps:$4 sm:$0xff]  }
  0x12   : > { %927 = vmatmul.mubr.msk.bf16.vlgmr.msra.gmra.mxu0 %vm238_vm1, %v950_v1  ;;  %402 = vmatprep.subr.bf16.mxu1 %v968_v16  ;;  %v976_v21 = vld [vmem:[%s1159_s2 + $0x40] ss:$8 sps:$4 sm:$0xff]   ;;  %v979_v22 = vld [vmem:[%s1159_s2 + $0xb4] ss:$8 sps:$4 sm:$0xff]   ;;  %vm385_vm2 = vcmask 523264   ;;  %vm554_vm4 = vcmask 1046528  }
  0x13   : > { %930 = vmatprep.mubr.msk.bf16.mxu0 %vm998_vm0, %v997_v0  ;;  %498 = vmatpush1.bf16.msra.mxu0 %v953_v4  ;;  %vm324_vm3 = vsmask.f32 7424  ;;  %v977_v39 = vld [vmem:[%s1159_s2 + $0xb0] ss:$8 sps:$4 sm:$0xff]   ;;  %v982_v43 = vld [vmem:[%s1159_s2 + $0xa4] ss:$8 sps:$4 sm:$0xff]  }
  0x14   : > { %499 = vmatprep.subr.bf16.mxu0 %v958_v5  ;;  %v980_v47 = vld [vmem:[%s1159_s2 + $0xa0] ss:$8 sps:$4 sm:$0xff]   ;;  %v985_v49 = vld [vmem:[%s1159_s2 + $0x94] ss:$8 sps:$4 sm:$0xff]   ;;  %v983_v52 = vld [vmem:[%s1159_s2 + $0x90] ss:$8 sps:$4 sm:$0xff]  }
  0x15   : > { %403 = vmatpush1.bf16.msra.mxu1 %v970_v17  ;;  %v988_v54 = vld [vmem:[%s1159_s2 + $0x84] ss:$8 sps:$4 sm:$0xff]   ;;  %v986_v56 = vld [vmem:[%s1159_s2 + $0x80] ss:$8 sps:$4 sm:$0xff]   ;;  %s914_s27 = sshll.u32 %s1163_s16, 5  ;;  %s915_s5 = sshll.u32 %s1163_s16, 2 }
  0x16   : > { %404 = vmatprep.subr.bf16.mxu1 %v971_v18  ;;  %s1144_s30 = scalar_lea.vmem %s1160_s3, %s914_s27  ;;  %vm739_vm5 = vcmask 1040384   ;;  %s210_s8 = scalar_lea.vmem %s1161_s4, %s915_s5 }
  0x17   : > { %500 = vmatpush1.bf16.msra.mxu0 %v956_v6 }
  0x18   : > { %501 = vmatprep.subr.bf16.mxu0 %v961_v7 }
  0x19   : > { %405 = vmatpush1.bf16.msra.mxu1 %v973_v19 }
  0x1a   : > { %931 = vmatmul.mubr.msk.bf16.gmra.mxu0 %vm238_vm1, %v951_v8  ;;  %406 = vmatprep.subr.bf16.mxu1 %v974_v20 }
  0x1b   : > { %934 = vmatprep.mubr.msk.bf16.mxu0 %vm998_vm0, %v997_v0  ;;  %502 = vmatpush1.bf16.msra.mxu0 %v959_v9 }
  0x1c   : > { %503 = vmatprep.subr.bf16.mxu0 %v966_v11 }
  0x1d   : > { %407 = vmatpush1.bf16.msra.mxu1 %v976_v21 }
  0x1e   : > { %614 = vmatprep.subr.bf16.mxu1 %v979_v22 }
  0x1f   : > { %504 = vmatpush1.bf16.msra.mxu0 %v964_v13 }
  0x22   : > { %935 = vmatmul.mubr.msk.bf16.gmra.mxu0 %vm238_vm1, %v952_v10 }
  0x23   : > { %521 = vmatprep.mubr.bf16.mxu0 %v999_v15 }
  0xd2   : > { %v282_v23 = vpop.f32.mrf.mxu0 }
  0xd4   : > { %v928_v24 = vpop.f32.mrf.mxu0 }
  0xd6   : > { %v285_v25 = vpop.f32.mrf.mxu0 }
  0xd7   : > { %v304_v26 = vpack.c.bf16 %v285_v25, %v282_v23 }
  0xd8   : > { %v929_v27 = vpop.f32.mrf.mxu0 }
  0xd9   : > { %886 = vmatmul.mubr.msk.bf16.vlgmr.msra.gmra.mxu0 %vm385_vm2, %v304_v26  ;;  %v328_v29 = vshll.u32 %v304_v26, 16  ;;  %v326_v35 = vshrl.u32 %v304_v26, 16  ;;  %v555_v58 = vrot.slane %v304_v26, 1 }
  0xda   : > { %v290_v28 = vpop.f32.mrf.mxu0  ;;  %531 = vmatprep.mubr.bf16.mxu0 %v999_v15 }
  0xdb   : > { %v330_v32 = vrot.slane %v328_v29, 1 }
  0xdc   : > { %v932_v30 = vpop.f32.mrf.mxu0 }
  0xdd   : > { %v331_v40 = vor.u32 %v330_v32, %v326_v35 }
  0xde   : > { %v293_v31 = vpop.f32.mrf.mxu0 }
  0xdf   : > { %v305_v33 = vpack.c.bf16 %v293_v31, %v290_v28 }
  0xe0   : > { %v933_v34 = vpop.f32.mrf.mxu0 }
  0xe1   : > { %887 = vmatmul.mubr.msk.bf16.gmra.mxu0 %vm385_vm2, %v305_v33  ;;  %v333_v36 = vshll.u32 %v305_v33, 16  ;;  %v337_v50 = vshrl.u32 %v305_v33, 16  ;;  %v556_v57 = vrot.slane %v305_v33, 1 }
  0xe2   : > { %v298_v37 = vpop.f32.mrf.mxu0 }
  0xe3   : > { %v314_v38 = vpack.c.bf16 %v298_v37, %v298_v37  ;;  %v335_v41 = vrot.slane %v333_v36, 1  ;;  %v557_v59 = vsel %vm554_vm4, %v555_v58, %v556_v57 }
  0xe4   : > { %v936_v42 = vpop.f32.mrf.mxu0 }
  0xe5   : > { %v341_v44 = vshll.u32 %v314_v38, 16  ;;  %v336_v45 = vsel %vm324_vm3, %v331_v40, %v335_v41  ;;  %v339_v53 = vor.u32 %v337_v50, %v335_v41  ;;  %v558_v60 = vrot.slane %v314_v38, 1 }
  0xe6   : > { %v301_v46 = vpop.f32.mrf.mxu0  ;;  %876 = vmatmul.mubr.msk.bf16.vlgmr.msra.gmra.mxu1 %vm385_vm2, %v336_v45 }
  0xe7   : > { %615 = vmatpush1.bf16.msra.mxu1 %v977_v39  ;;  %434 = vmatprep.mubr.bf16.mxu1 %v999_v15  ;;  %v343_v51 = vrot.slane %v341_v44, 1  ;;  %v559_v61 = vsel %vm554_vm4, %v556_v57, %v558_v60 }
  0xe8   : > { %v937_v48 = vpop.f32.mrf.mxu0  ;;  %616 = vmatprep.subr.bf16.mxu1 %v982_v43 }
  0xe9   : > { %v344_v55 = vsel %vm324_vm3, %v339_v53, %v343_v51 }
  0xeb   : > { %617 = vmatpush1.bf16.msra.mxu1 %v980_v47 }
  0xec   : > { %618 = vmatprep.subr.bf16.mxu1 %v985_v49 }
  0xee   : > { %877 = vmatmul.mubr.msk.bf16.gmra.mxu1 %vm385_vm2, %v344_v55 }
  0xef   : > { %619 = vmatpush1.bf16.msra.mxu1 %v983_v52  ;;  %638 = vmatprep.mubr.bf16.mxu1 %v999_v15 }
  0xf0   : > { %620 = vmatprep.subr.bf16.mxu1 %v988_v54 }
  0xf3   : > { %621 = vmatpush1.bf16.msra.mxu1 %v986_v56 }
  0xf6   : > { %904 = vmatmul.mubr.msk.bf16.vlgmr.msra.gmra.mxu1 %vm385_vm2, %v557_v59 }
  0xf7   : > { %648 = vmatprep.mubr.bf16.mxu1 %v999_v15 }
  0xfe   : > { %905 = vmatmul.mubr.msk.bf16.gmra.mxu1 %vm385_vm2, %v559_v61 }
 0x199   : > { %v523_v62 = vpop.f32.mrf.mxu0 }
 0x19b   : > { %v525_v1 = vpop.f32.mrf.mxu0 }
 0x19d   : > { %v527_v4 = vpop.f32.mrf.mxu0 }
 0x19f   : > { %v529_v7 = vpop.f32.mrf.mxu0 }
 0x1a1   : > { %v533_v10 = vpop.f32.mrf.mxu0 }
 0x1a3   : > { %v535_v15 = vpop.f32.mrf.mxu0 }
 0x1a5   : > { %v537_v24 = vpop.f32.mrf.mxu0 }
 0x1a6   : > { %v426_v63 = vpop.f32.mrf.mxu1 }
 0x1a7   : > { %v524_v12 = vadd.f32 %v523_v62, %v426_v63  ;;  %v539_v33 = vpop.f32.mrf.mxu0 }
 0x1a8   : > { %v428_v0 = vpop.f32.mrf.mxu1 }
 0x1a9   : > { %v526_v13 = vadd.f32 %v525_v1, %v428_v0 }
 0x1aa   : > { %v430_v2 = vpop.f32.mrf.mxu1 }
 0x1ab   : > { %v528_v16 = vadd.f32 %v527_v4, %v430_v2 }
 0x1ac   : > { %v432_v3 = vpop.f32.mrf.mxu1 }
 0x1ad   : > { %v530_v20 = vadd.f32 %v529_v7, %v432_v3 }
 0x1ae   : > { %v436_v5 = vpop.f32.mrf.mxu1 }
 0x1af   : > { %v534_v26 = vadd.f32 %v533_v10, %v436_v5 }
 0x1b0   : > { %v438_v6 = vpop.f32.mrf.mxu1 }
 0x1b1   : > { %v536_v28 = vadd.f32 %v535_v15, %v438_v6 }
 0x1b2   : > { %v440_v8 = vpop.f32.mrf.mxu1 }
 0x1b3   : > { %v538_v34 = vadd.f32 %v537_v24, %v440_v8 }
 0x1b4   : > { %v442_v9 = vpop.f32.mrf.mxu1 }
 0x1b5   : > { %v540_v38 = vadd.f32 %v539_v33, %v442_v9 }
 0x1b6   : > { %v640_v11 = vpop.f32.mrf.mxu1 }
 0x1b7   : > { %v659_v17 = vadd.f32 %v640_v11, %v524_v12 }
 0x1b8   : > { %v642_v14 = vpop.f32.mrf.mxu1 }
 0x1b9   : > { %v660_v18 = vadd.f32 %v642_v14, %v526_v13  ;;  %v713_v35 = vmul.f32 %v659_v17, %v659_v17 }
 0x1ba   : > { %v644_v19 = vpop.f32.mrf.mxu1 }
 0x1bb   : > { %v916_v21 = vpack.c.bf16 %v660_v18, %v659_v17  ;;  %v661_v22 = vadd.f32 %v644_v19, %v528_v16  ;;  %v714_v47 = vmul.f32 %v660_v18, %v660_v18 }
 0x1bc   : > { %v646_v23 = vpop.f32.mrf.mxu1 }
 0x1bd   : > { %691 = vst [vmem:[%s1144_s30] sm:$0xff] %v916_v21  ;;  %v662_v25 = vadd.f32 %v646_v23, %v530_v20  ;;  %v715_v29 = vmul.f32 %v661_v22, %v661_v22  ;;  %v695_v36 = vadd.f32 %v661_v22, %v659_v17 }
 0x1be   : > { %v650_v27 = vpop.f32.mrf.mxu1 }
 0x1bf   : > { %v917_v30 = vpack.c.bf16 %v662_v25, %v661_v22  ;;  %v663_v31 = vadd.f32 %v650_v27, %v534_v26  ;;  %v704_v39 = vadd.f32 %v662_v25, %v660_v18  ;;  %v716_v40 = vmul.f32 %v662_v25, %v662_v25 }
 0x1c0   : > { %v652_v32 = vpop.f32.mrf.mxu1  ;;  %v721_v43 = vadd.f32 %v715_v29, %v713_v35 }
 0x1c1   : > { %692 = vst [vmem:[%s1144_s30 + $0x8] sm:$0xff] %v917_v30  ;;  %v664_v37 = vadd.f32 %v652_v32, %v536_v28  ;;  %v717_v41 = vmul.f32 %v663_v31, %v663_v31  ;;  %v696_v44 = vadd.f32 %v695_v36, %v663_v31  ;;  %v730_v55 = vadd.f32 %v716_v40, %v714_v47 }
 0x1c2   : > { %v654_v42 = vpop.f32.mrf.mxu1 }
 0x1c3   : > { %v918_v45 = vpack.c.bf16 %v664_v37, %v663_v31  ;;  %v665_v46 = vadd.f32 %v654_v42, %v538_v34  ;;  %v705_v48 = vadd.f32 %v704_v39, %v664_v37  ;;  %v718_v49 = vmul.f32 %v664_v37, %v664_v37 }
 0x1c4   : > { %v656_v50 = vpop.f32.mrf.mxu1  ;;  %v722_v51 = vadd.f32 %v721_v43, %v717_v41 }
 0x1c5   : > { %693 = vst [vmem:[%s1144_s30 + $0x10] sm:$0xff] %v918_v45  ;;  %v697_v52 = vadd.f32 %v696_v44, %v665_v46  ;;  %v719_v53 = vmul.f32 %v665_v46, %v665_v46  ;;  %v666_v54 = vadd.f32 %v656_v50, %v540_v38  ;;  %v731_v60 = vadd.f32 %v730_v55, %v718_v49 }
 0x1c7   : > { %v698_v56 = vrot.slane %v697_v52, 4  ;;  %v723_v57 = vadd.f32 %v722_v51, %v719_v53  ;;  %v919_v58 = vpack.c.bf16 %v666_v54, %v665_v46  ;;  %v706_v59 = vadd.f32 %v705_v48, %v666_v54 }
 0x1c8   : > { %v720_v61 = vmul.f32 %v666_v54, %v666_v54 }
 0x1c9   : > { %v699_v62 = vadd.f32 %v698_v56, %v697_v52  ;;  %v724_v63 = vrot.slane %v723_v57, 4  ;;  %694 = vst [vmem:[%s1144_s30 + $0x18] sm:$0xff] %v919_v58  ;;  %v707_v0 = vrot.slane %v706_v59, 4 }
 0x1ca   : > { %v732_v1 = vadd.f32 %v731_v60, %v720_v61 }
 0x1cb   : > { %v700_v2 = vrot.slane %v699_v62, 2  ;;  %v725_v3 = vadd.f32 %v724_v63, %v723_v57  ;;  %v708_v4 = vadd.f32 %v707_v0, %v706_v59 }
 0x1cc   : > { %v733_v5 = vrot.slane %v732_v1, 4 }
 0x1cd   : > { %v726_v6 = vrot.slane %v725_v3, 2  ;;  %v709_v7 = vrot.slane %v708_v4, 2  ;;  %v701_v8 = vadd.f32 %v700_v2, %v699_v62 }
 0x1ce   : > { %v734_v9 = vadd.f32 %v733_v5, %v732_v1 }
 0x1cf   : > { %v727_v10 = vadd.f32 %v726_v6, %v725_v3  ;;  %v710_v11 = vadd.f32 %v709_v7, %v708_v4  ;;  %v702_v14 = vrot.slane %v701_v8, 1 }
 0x1d0   : > { %v735_v12 = vrot.slane %v734_v9, 2 }
 0x1d1   : > { %v728_v13 = vrot.slane %v727_v10, 1  ;;  %v711_v15 = vrot.slane %v710_v11, 1  ;;  %v703_v19 = vadd.f32 %v702_v14, %v701_v8 }
 0x1d2   : > { %v736_v16 = vadd.f32 %v735_v12, %v734_v9 }
 0x1d3   : > { %v729_v17 = vadd.f32 %v728_v13, %v727_v10  ;;  %v712_v20 = vadd.f32 %v711_v15, %v710_v11 }
 0x1d4   : > { %v737_v18 = vrot.slane %v736_v16, 1 }
 0x1d5   : > { %v740_v22 = vsel %vm739_vm5, %v703_v19, %v729_v17 }
 0x1d6   : > { %v738_v21 = vadd.f32 %v737_v18, %v736_v16 }
 0x1d8   : > { %v741_v23 = vsel %vm739_vm5, %v712_v20, %v738_v21 }
 0x1d9   : > { %v744_v24 = vcombine.low %v740_v22, %v741_v23 }
 0x1db   : > { %910 = vst.sshfl [vmem:[%s210_s8] sm:$0x33 pattern:$0x76325410] %v744_v24 }
 0x1dc PF: > { %s15_s15 = sadd.s32 1, %s995_s15  }
 0x1dd   : > { %p12_p4 = scmp.ge.s32.totalorder %s15_s15, 4  }
 0x1df   :  { %14 = sbr.rel (!%p12_p4) target bundleno = 1 (0x1), region = 76 }

</bundles_post_ra>
